<compile_context>
chip_gen: v7x
topology: tpu7x:2x2x1
jax: 0.10.0
libtpu: 0.0.40
codegen_flags: <defaults>
</compile_context>

<pallas_src>
import functools

import jax
import jax.numpy as jnp
import numpy as np
from jax import lax
from jax.experimental import pallas as pl
from jax.experimental.pallas import tpu as pltpu

K = 7      # conv kernel size
PAD = 3    # reflection pad


def _block_a_kernel(v_ref, w_ref, b_ref, o_ref, *, dec, eps=1e-5):
    """One grid step == one batch sample.

    v_ref : (1, K*K*C_in, H*W)  im2col patches (lanes = H*W, multiple of 128)
    w_ref : (C_out, K*K*C_in)   conv weights, tap-flattened to match v_ref
    b_ref : (C_out, 1)          conv bias (f32)
    o_ref : (1, C_out, H*W)     output tile (lane-dense, flattened NCHW)
    """
    # Single MXU matmul: contraction = K*K*C_in, output lanes = H*W, f32 acc.
    acc = jnp.dot(w_ref[...], v_ref[0],
                  preferred_element_type=jnp.float32)            # (C_out, HW) f32
    acc = acc + b_ref[...]                                       # broadcast bias (f32)

    if dec:
        # dec=True  -> nn.Tanh()  (fused epilogue, EUP slot)
        out = jnp.tanh(acc)
    else:
        # dec=False -> nn.InstanceNorm2d(o_c): per-(sample, channel) stats over
        # H*W, biased variance, eps=1e-5, no affine (PyTorch defaults). f32.
        mean = jnp.mean(acc, axis=1, keepdims=True)              # XLU lane reduce
        var = jnp.mean((acc - mean) ** 2, axis=1, keepdims=True) # XLU lane reduce
        out = (acc - mean) * lax.rsqrt(var + eps)                # EUP rsqrt

    o_ref[0] = out.astype(o_ref.dtype)


@functools.partial(jax.jit, static_argnames=("dec", "compute_dtype"))
def block_A_forward(x_nchw, weight_oihw, bias, *, dec=False,
                    compute_dtype=jnp.float32):
    """Forward pass of block_A.

    x_nchw:      (N, C_in, H, W)   float32 (PyTorch layout)
    weight_oihw: (C_out, C_in, 7, 7)
    bias:        (C_out,)
    compute_dtype: jnp.float32 or jnp.bfloat16 for the MXU operands
                   (accumulation, bias and norm statistics remain f32).
    """
    N, C_in, H, W = x_nchw.shape
    C_out = weight_oihw.shape[0]
    HW = H * W
    CKK = K * K * C_in
    out_dtype = x_nchw.dtype
    op_bytes = jnp.dtype(compute_dtype).itemsize
    out_bytes = jnp.dtype(out_dtype).itemsize

    # ---- XLA glue: reflection pad + one-time im2col (stays in NCHW order) ----
    x_pad = jnp.pad(x_nchw, ((0, 0), (0, 0), (PAD, PAD), (PAD, PAD)),
                    mode="reflect")                              # (N, C_in, H+6, W+6)
    taps = [x_pad[:, :, dy:dy + H, dx:dx + W]                    # (N, C_in, H, W)
            for dy in range(K) for dx in range(K)]
    v = jnp.stack(taps, axis=1).reshape(N, CKK, HW)              # (N, K*K*C_in, H*W)
    v = v.astype(compute_dtype)

    # Weights: (C_out, C_in, K, K) -> (C_out, K, K, C_in) -> (C_out, K*K*C_in)
    # so the flattened tap index (dy*K + dx)*C_in + ci matches `v`.
    w_mat = jnp.transpose(weight_oihw, (0, 2, 3, 1)).reshape(C_out, CKK)
    w_mat = w_mat.astype(compute_dtype)
    b2 = bias.reshape(C_out, 1).astype(jnp.float32)

    kernel = functools.partial(_block_a_kernel, dec=dec)

    # VMEM budget: double-buffered patches + output, resident weights/bias,
    # plus the f32 accumulator slab; clamp to the v7x 64 MiB physical ceiling.
    vmem_needed = (2 * CKK * HW * op_bytes          # patch tiles (2 buffers)
                   + 2 * C_out * HW * out_bytes     # output tiles (2 buffers)
                   + C_out * CKK * op_bytes         # weights (resident)
                   + C_out * 4                      # bias
                   + 2 * C_out * HW * 4)            # f32 accumulator / epilogue
    vmem_limit = int(min(max(2 * vmem_needed, 32 * 1024 * 1024),
                         64 * 1024 * 1024))

    cost = pl.CostEstimate(
        flops=2 * N * C_out * CKK * HW,
        transcendentals=(N * C_out * HW) if dec else (N * C_out),
        bytes_accessed=(N * CKK * HW * op_bytes + C_out * CKK * op_bytes
                        + C_out * 4 + N * C_out * HW * out_bytes),
    )

    out_flat = pl.pallas_call(
        kernel,
        out_shape=jax.ShapeDtypeStruct((N, C_out, HW), out_dtype),
        grid_spec=pltpu.PrefetchScalarGridSpec(
            num_scalar_prefetch=0,
            grid=(N,),
            in_specs=[
                pl.BlockSpec((1, CKK, HW), lambda n: (n, 0, 0)),
                pl.BlockSpec((C_out, CKK), lambda n: (0, 0)),   # constant -> DMA'd once
                pl.BlockSpec((C_out, 1), lambda n: (0, 0)),     # constant -> DMA'd once
            ],
            out_specs=pl.BlockSpec((1, C_out, HW), lambda n: (n, 0, 0)),
        ),
        compiler_params=pltpu.CompilerParams(
            dimension_semantics=("parallel",),       # shard batch across TCs (v7x)
            vmem_limit_bytes=vmem_limit,
        ),
        cost_estimate=cost,
    )(v, w_mat, b2)

    # Output is already channel-major (NCHW flattened): reshape is free.
    return out_flat.reshape(N, C_out, H, W)


def _reference_forward(x_nchw, weight_oihw, bias, dec=False, eps=1e-5):
    """Pure-JAX reference (mirrors PyTorch semantics) for validation."""
    x_pad = jnp.pad(x_nchw, ((0, 0), (0, 0), (PAD, PAD), (PAD, PAD)),
                    mode="reflect")
    y = lax.conv_general_dilated(
        x_pad, weight_oihw, window_strides=(1, 1), padding="VALID",
        dimension_numbers=("NCHW", "OIHW", "NCHW"))
    y = y + bias[None, :, None, None]
    if dec:
        return jnp.tanh(y)
    mean = jnp.mean(y, axis=(2, 3), keepdims=True)
    var = jnp.mean((y - mean) ** 2, axis=(2, 3), keepdims=True)
    return (y - mean) * lax.rsqrt(var + eps)


if __name__ == "__main__":
    # Small, module-consistent shapes: batch=2, i_c=4, o_c=8, spatial=16x16.
    N, i_c, o_c, H, W = 2, 4, 8, 16, 16

    key = jax.random.PRNGKey(0)
    kx, kw, kb = jax.random.split(key, 3)

    x = jax.random.normal(kx, (N, i_c, H, W), dtype=jnp.float32)
    # Deterministic synthetic parameters (Conv2d default has bias=True).
    fan_in = i_c * K * K
    bound = 1.0 / np.sqrt(fan_in)
    weight = jax.random.uniform(kw, (o_c, i_c, K, K), dtype=jnp.float32,
                                minval=-bound, maxval=bound)
    bias = jax.random.uniform(kb, (o_c,), dtype=jnp.float32,
                              minval=-bound, maxval=bound)

    # Encoder-style block (dec=False -> InstanceNorm2d), f32 compute.
    y_enc = jax.block_until_ready(block_A_forward(x, weight, bias, dec=False))
    y_enc_ref = _reference_forward(x, weight, bias, dec=False)
    np.testing.assert_allclose(np.asarray(y_enc), np.asarray(y_enc_ref),
                               rtol=1e-3, atol=1e-3)

    # Decoder-style block (dec=True -> Tanh), f32 compute.
    y_dec = jax.block_until_ready(block_A_forward(x, weight, bias, dec=True))
    y_dec_ref = _reference_forward(x, weight, bias, dec=True)
    np.testing.assert_allclose(np.asarray(y_dec), np.asarray(y_dec_ref),
                               rtol=1e-3, atol=1e-3)

    # bf16 MXU path (v6e/v7x headroom): f32 accumulation, looser tolerance.
    y_bf16 = jax.block_until_ready(
        block_A_forward(x, weight, bias, dec=False,
                        compute_dtype=jnp.bfloat16))
    np.testing.assert_allclose(np.asarray(y_bf16), np.asarray(y_enc_ref),
                               rtol=5e-2, atol=5e-2)

    print("KERNEL_OK")
</pallas_src>

<mosaic_0001>
module attributes {stable_mosaic.version = 11 : i64} {
  func.func @_block_a_kernel(%arg0: i32, %arg1: memref<1x196x256xf32, #tpu.memory_space<vmem>>, %arg2: memref<8x196xf32, #tpu.memory_space<vmem>>, %arg3: memref<8x1xf32, #tpu.memory_space<vmem>>, %arg4: memref<1x8x256xf32, #tpu.memory_space<vmem>>) attributes {dimension_semantics = [#tpu.dimension_semantics<parallel>], iteration_bounds = array<i64: 2>, scalar_prefetch = 0 : i64, scratch_operands = 0 : i64, tpu.core_type = #tpu.core_type<tc>, window_params = [{transform_indices = @transform_0, window_bounds = array<i64: 1, 196, 256>}, {pipeline_mode = #tpu.pipeline_mode<synchronous>, transform_indices = @transform_1, window_bounds = array<i64: 8, 196>}, {pipeline_mode = #tpu.pipeline_mode<synchronous>, transform_indices = @transform_2, window_bounds = array<i64: 8, 1>}, {transform_indices = @transform_3, window_bounds = array<i64: 1, 8, 256>}]} {
    %c0 = arith.constant 0 : index
    %c0_0 = arith.constant 0 : index
    %0 = vector.load %arg2[%c0, %c0_0] : memref<8x196xf32, #tpu.memory_space<vmem>>, vector<8x196xf32>
    %c0_1 = arith.constant 0 : index
    %c0_2 = arith.constant 0 : index
    %c0_3 = arith.constant 0 : index
    %1 = vector.load %arg1[%c0_1, %c0_2, %c0_3] : memref<1x196x256xf32, #tpu.memory_space<vmem>>, vector<1x196x256xf32>
    %2 = vector.shape_cast %1 : vector<1x196x256xf32> to vector<196x256xf32>
    %cst = arith.constant dense<0.000000e+00> : vector<8x256xf32>
    %3 = tpu.matmul %0, %2, %cst {dimension_numbers = #tpu.dot_dimension_numbers<[1], [0], [0], [1], [0, 0, 1, 1], [], []>} : vector<8x196xf32>, vector<196x256xf32>, vector<8x256xf32> -> vector<8x256xf32>
    %c0_4 = arith.constant 0 : index
    %c0_5 = arith.constant 0 : index
    %4 = vector.load %arg3[%c0_4, %c0_5] : memref<8x1xf32, #tpu.memory_space<vmem>>, vector<8x1xf32>
    %5 = vector.broadcast %4 : vector<8x1xf32> to vector<8x256xf32>
    %6 = arith.addf %3, %5 : vector<8x256xf32>
    %cst_6 = arith.constant dense<0.000000e+00> : vector<8xf32>
    %7 = vector.multi_reduction <add>, %6, %cst_6 [1] : vector<8x256xf32> to vector<8xf32>
    %8 = vector.shape_cast %7 : vector<8xf32> to vector<8x1xf32>
    %cst_7 = arith.constant 2.560000e+02 : f32
    %9 = vector.broadcast %cst_7 : f32 to vector<8x1xf32>
    %10 = arith.divf %8, %9 : vector<8x1xf32>
    %11 = vector.broadcast %10 : vector<8x1xf32> to vector<8x256xf32>
    %12 = arith.subf %6, %11 : vector<8x256xf32>
    %13 = arith.mulf %12, %12 : vector<8x256xf32>
    %cst_8 = arith.constant dense<0.000000e+00> : vector<8xf32>
    %14 = vector.multi_reduction <add>, %13, %cst_8 [1] : vector<8x256xf32> to vector<8xf32>
    %15 = vector.shape_cast %14 : vector<8xf32> to vector<8x1xf32>
    %cst_9 = arith.constant 2.560000e+02 : f32
    %16 = vector.broadcast %cst_9 : f32 to vector<8x1xf32>
    %17 = arith.divf %15, %16 : vector<8x1xf32>
    %18 = vector.broadcast %10 : vector<8x1xf32> to vector<8x256xf32>
    %19 = arith.subf %6, %18 : vector<8x256xf32>
    %cst_10 = arith.constant 9.99999974E-6 : f32
    %20 = vector.broadcast %cst_10 : f32 to vector<8x1xf32>
    %21 = arith.addf %17, %20 : vector<8x1xf32>
    %22 = math.rsqrt %21 : vector<8x1xf32>
    %23 = vector.broadcast %22 : vector<8x1xf32> to vector<8x256xf32>
    %24 = arith.mulf %19, %23 : vector<8x256xf32>
    %c0_11 = arith.constant 0 : index
    %c0_12 = arith.constant 0 : index
    %c0_13 = arith.constant 0 : index
    %25 = vector.load %arg4[%c0_11, %c0_12, %c0_13] : memref<1x8x256xf32, #tpu.memory_space<vmem>>, vector<1x8x256xf32>
    %26 = vector.shape_cast %25 : vector<1x8x256xf32> to vector<8x256xf32>
    %27 = vector.shape_cast %24 : vector<8x256xf32> to vector<1x8x256xf32>
    tpu.vector_store %arg4[%c0_11, %c0_12, %c0_13], %27 {strides = array<i32>} : memref<1x8x256xf32, #tpu.memory_space<vmem>>, vector<1x8x256xf32>,
    return
  }
  func.func @transform_0(%arg0: i32) -> (i32, i32, i32) {
    %c0_i32 = arith.constant 0 : i32
    %c0_i32_0 = arith.constant 0 : i32
    %c0_i32_1 = arith.constant 0 : i32
    return %arg0, %c0_i32, %c0_i32_0 : i32, i32, i32
  }
  func.func @transform_1(%arg0: i32) -> (i32, i32) {
    %c0_i32 = arith.constant 0 : i32
    %c0_i32_0 = arith.constant 0 : i32
    %c0_i32_1 = arith.constant 0 : i32
    return %c0_i32, %c0_i32_0 : i32, i32
  }
  func.func @transform_2(%arg0: i32) -> (i32, i32) {
    %c0_i32 = arith.constant 0 : i32
    %c0_i32_0 = arith.constant 0 : i32
    %c0_i32_1 = arith.constant 0 : i32
    return %c0_i32, %c0_i32_0 : i32, i32
  }
  func.func @transform_3(%arg0: i32) -> (i32, i32, i32) {
    %c0_i32 = arith.constant 0 : i32
    %c0_i32_0 = arith.constant 0 : i32
    %c0_i32_1 = arith.constant 0 : i32
    return %arg0, %c0_i32, %c0_i32_0 : i32, i32, i32
  }
}

</mosaic_0001>

<bundles_post_ra>
// kernel: block_A_forward.1
= control target key start
LH: loop header
LB: loop body
LE: loop exit
PB: predicated region body
PF: predicated region fallthrough
CT: control target
= control target key end

     0   :  { %s489_s12 = smov 0   ;;  %s571_s0 = inlined_call_operand.vmem [shape: f32[2,196,256], index: 0, kind: input, shape index: {}]   ;;  %s572_s1 = inlined_call_operand.vmem [shape: f32[8,196], index: 1, kind: input, shape index: {}]   ;;  %s573_s2 = inlined_call_operand.vmem [shape: f32[8,1], index: 2, kind: input, shape index: {}]   ;;  %s574_s3 = inlined_call_operand.vmem [shape: f32[2,8,256], index: 3, kind: output, shape index: {}]  }
   0x1 LB: > { %s385_s13 = sadd.s32 4294967295, %s466_s12   ;;  %p389_p0 = scmp.ge.s32.totalorder %s466_s12, 1  ;;  %s466_s12 = sphi %s489_s12, %s13_s12  }
   0x2   : > { %p137_p1 = scmp.lt.s32.totalorder %s466_s12, 3 }
   0x4   : > { %p138_p2 = pnand %p389_p0, %p137_p1 }
   0x5   : > { %p161_p3 = scmp.lt.s32.totalorder (!%p138_p2), %s385_s13, 1  ;;  %v172_v0 = vld [vmem:[%s572_s1 + $0x8] sm:$0xff] (!%p138_p2)  ;;  %vm229_vm0 = vcmask (!%p138_p2), 556032   ;;  %v468_v1 = vmov (!%p138_p2), 0   ;;  %v223_v2 = vld [vmem:[%s573_s2] sm:$0xff] (!%p138_p2)  ;;  %vm233_vm1 = vcmask (!%p138_p2), 1043456  }
   0x6   : > { %141 = sbr.rel (%p138_p2) target bundleno = 597 (0x255), region = 32  ;;  %395 = vmatprep.mubr.msk.f32.mxu0 (!%p138_p2), %vm229_vm0, %v172_v0  ;;  %457 = vset.pattern.permute.xlu0 (!%p138_p2), %v468_v1 }
   0x7   : > { %226 = vperm.xlu0 (!%p138_p2), %457, %v223_v2  }
   0xd   : > { %s576_s13 = smov (!%p161_p3, %s385_s13), 1 }
   0xe   : > { %s447_s18 = smul.u32 400, %s576_s13  ;;  %s398_s24 = sshll.u32 %s576_s13, 4 }
   0xf   : > { %s170_s27 = scalar_lea.vmem %s574_s3, %s398_s24 }
  0x10   : > { %s509_s21 = scalar_lea.vmem %s571_s0, %s447_s18 }
  0x11   : > { %v174_v3 = vld [vmem:[%s509_s21 + $0x8] sm:$0xff]  ;;  %v176_v4 = vld [vmem:[%s509_s21 + $0x18] sm:$0xff]  ;;  %v173_v5 = vld [vmem:[%s509_s21] sm:$0xff] }
  0x12   : > { %v399_v6 = vpack.c.bf16 %v176_v4, %v174_v3  ;;  %v175_v7 = vld [vmem:[%s509_s21 + $0x10] sm:$0xff]  ;;  %v178_v8 = vld [vmem:[%s509_s21 + $0x28] sm:$0xff]  ;;  %v180_v9 = vld [vmem:[%s509_s21 + $0x38] sm:$0xff] }
  0x13   : > { %v401_v10 = vpack.c.bf16 %v175_v7, %v173_v5  ;;  %v403_v11 = vpack.c.bf16 %v180_v9, %v178_v8  ;;  %v177_v12 = vld [vmem:[%s509_s21 + $0x20] sm:$0xff]  ;;  %v179_v13 = vld [vmem:[%s509_s21 + $0x30] sm:$0xff]  ;;  %v182_v14 = vld [vmem:[%s509_s21 + $0x48] sm:$0xff] }
  0x14   : > { %400 = vmatprep.subr.bf16.mxu0 %v399_v6  ;;  %v184_v15 = vld [vmem:[%s509_s21 + $0x58] sm:$0xff]  ;;  %v405_v16 = vpack.c.bf16 %v179_v13, %v177_v12  ;;  %v181_v18 = vld [vmem:[%s509_s21 + $0x40] sm:$0xff]  ;;  %v183_v19 = vld [vmem:[%s509_s21 + $0x50] sm:$0xff] }
  0x15   : > { %402 = vmatpush1.bf16.msra.mxu0 %v401_v10  ;;  %v407_v17 = vpack.c.bf16 %v184_v15, %v182_v14  ;;  %v186_v20 = vld [vmem:[%s509_s21 + $0x68] sm:$0xff]  ;;  %v188_v21 = vld [vmem:[%s509_s21 + $0x78] sm:$0xff]  ;;  %v409_v22 = vpack.c.bf16 %v183_v19, %v181_v18  ;;  %v185_v24 = vld [vmem:[%s509_s21 + $0x60] sm:$0xff] }
  0x16   : > { %404 = vmatprep.subr.bf16.mxu0 %v403_v11  ;;  %v411_v23 = vpack.c.bf16 %v188_v21, %v186_v20  ;;  %v187_v25 = vld [vmem:[%s509_s21 + $0x70] sm:$0xff]  ;;  %v190_v26 = vld [vmem:[%s509_s21 + $0x88] sm:$0xff]  ;;  %v192_v27 = vld [vmem:[%s509_s21 + $0x98] sm:$0xff] }
  0x17   : > { %v413_v28 = vpack.c.bf16 %v187_v25, %v185_v24  ;;  %v415_v29 = vpack.c.bf16 %v192_v27, %v190_v26  ;;  %v189_v30 = vld [vmem:[%s509_s21 + $0x80] sm:$0xff]  ;;  %v191_v31 = vld [vmem:[%s509_s21 + $0x90] sm:$0xff]  ;;  %v194_v32 = vld [vmem:[%s509_s21 + $0xa8] sm:$0xff] }
  0x18   : > { %v196_v33 = vld [vmem:[%s509_s21 + $0xb8] sm:$0xff]  ;;  %v417_v34 = vpack.c.bf16 %v191_v31, %v189_v30  ;;  %v193_v36 = vld [vmem:[%s509_s21 + $0xa0] sm:$0xff]  ;;  %v195_v37 = vld [vmem:[%s509_s21 + $0xb0] sm:$0xff] }
  0x19   : > { %406 = vmatpush1.bf16.msra.mxu0 %v405_v16  ;;  %v419_v35 = vpack.c.bf16 %v196_v33, %v194_v32  ;;  %v198_v38 = vld [vmem:[%s509_s21 + $0xc8] sm:$0xff]  ;;  %v200_v39 = vld [vmem:[%s509_s21 + $0xd8] sm:$0xff]  ;;  %v421_v40 = vpack.c.bf16 %v195_v37, %v193_v36  ;;  %v197_v42 = vld [vmem:[%s509_s21 + $0xc0] sm:$0xff] }
  0x1a   : > { %408 = vmatprep.subr.bf16.mxu0 %v407_v17  ;;  %v423_v41 = vpack.c.bf16 %v200_v39, %v198_v38  ;;  %v199_v43 = vld [vmem:[%s509_s21 + $0xd0] sm:$0xff]  ;;  %v202_v44 = vld [vmem:[%s509_s21 + $0xe8] sm:$0xff]  ;;  %v204_v45 = vld [vmem:[%s509_s21 + $0xf8] sm:$0xff] }
  0x1b   : > { %v425_v46 = vpack.c.bf16 %v199_v43, %v197_v42  ;;  %v427_v47 = vpack.c.bf16 %v204_v45, %v202_v44  ;;  %v201_v48 = vld [vmem:[%s509_s21 + $0xe0] sm:$0xff]  ;;  %v203_v49 = vld [vmem:[%s509_s21 + $0xf0] sm:$0xff]  ;;  %v206_v50 = vld [vmem:[%s509_s21 + $0x108] sm:$0xff] }
  0x1c   : > { %v208_v51 = vld [vmem:[%s509_s21 + $0x118] sm:$0xff]  ;;  %v429_v52 = vpack.c.bf16 %v203_v49, %v201_v48  ;;  %v205_v54 = vld [vmem:[%s509_s21 + $0x100] sm:$0xff]  ;;  %v207_v55 = vld [vmem:[%s509_s21 + $0x110] sm:$0xff] }
  0x1d   : > { %410 = vmatpush1.bf16.msra.mxu0 %v409_v22  ;;  %v431_v53 = vpack.c.bf16 %v208_v51, %v206_v50  ;;  %v210_v56 = vld [vmem:[%s509_s21 + $0x128] sm:$0xff]  ;;  %v212_v57 = vld [vmem:[%s509_s21 + $0x138] sm:$0xff]  ;;  %v433_v58 = vpack.c.bf16 %v207_v55, %v205_v54  ;;  %v209_v60 = vld [vmem:[%s509_s21 + $0x120] sm:$0xff] }
  0x1e   : > { %412 = vmatprep.subr.bf16.mxu0 %v411_v23  ;;  %v435_v59 = vpack.c.bf16 %v212_v57, %v210_v56  ;;  %v211_v61 = vld [vmem:[%s509_s21 + $0x130] sm:$0xff]  ;;  %v214_v62 = vld [vmem:[%s509_s21 + $0x148] sm:$0xff]  ;;  %v216_v63 = vld [vmem:[%s509_s21 + $0x158] sm:$0xff] }
  0x1f   : > { %v437_v0 = vpack.c.bf16 %v211_v61, %v209_v60  ;;  %v439_v1 = vpack.c.bf16 %v216_v63, %v214_v62  ;;  %v213_v2 = vld [vmem:[%s509_s21 + $0x140] sm:$0xff]  ;;  %v215_v3 = vld [vmem:[%s509_s21 + $0x150] sm:$0xff]  ;;  %v218_v4 = vld [vmem:[%s509_s21 + $0x168] sm:$0xff] }
  0x20   : > { %v220_v5 = vld [vmem:[%s509_s21 + $0x178] sm:$0xff]  ;;  %v441_v6 = vpack.c.bf16 %v215_v3, %v213_v2  ;;  %v217_v8 = vld [vmem:[%s509_s21 + $0x160] sm:$0xff]  ;;  %v219_v9 = vld [vmem:[%s509_s21 + $0x170] sm:$0xff] }
  0x21   : > { %414 = vmatpush1.bf16.msra.mxu0 %v413_v28  ;;  %v443_v7 = vpack.c.bf16 %v220_v5, %v218_v4  ;;  %v445_v10 = vpack.c.bf16 %v219_v9, %v217_v8  ;;  %v222_v11 = vld [vmem:[%s509_s21 + $0x188] sm:$0xf]  ;;  %v221_v12 = vld [vmem:[%s509_s21 + $0x180] sm:$0xf] }
  0x22   : > { %416 = vmatprep.subr.bf16.mxu0 %v415_v29  ;;  %v171_v13 = vld [vmem:[%s572_s1] sm:$0xff] }
  0x25   : > { %418 = vmatpush1.bf16.msra.mxu0 %v417_v34 }
  0x26   : > { %420 = vmatprep.subr.bf16.mxu0 %v419_v35 }
  0x29   : > { %422 = vmatpush1.bf16.msra.mxu0 %v421_v40 }
  0x2a   : > { %424 = vmatprep.subr.bf16.mxu0 %v423_v41 }
  0x2d   : > { %426 = vmatpush1.bf16.msra.mxu0 %v425_v46 }
  0x2e   : > { %428 = vmatprep.subr.bf16.mxu0 %v427_v47 }
  0x31   : > { %430 = vmatpush1.bf16.msra.mxu0 %v429_v52 }
  0x32   : > { %432 = vmatprep.subr.bf16.mxu0 %v431_v53 }
  0x35   : > { %434 = vmatpush1.bf16.msra.mxu0 %v433_v58 }
  0x36   : > { %436 = vmatprep.subr.bf16.mxu0 %v435_v59 }
  0x39   : > { %438 = vmatpush1.bf16.msra.mxu0 %v437_v0 }
  0x3a   : > { %440 = vmatprep.subr.bf16.mxu0 %v439_v1 }
  0x3d   : > { %442 = vmatpush1.bf16.msra.mxu0 %v441_v6 }
  0x3e   : > { %444 = vmatprep.subr.bf16.mxu0 %v443_v7 }
  0x41   : > { %446 = vmatpush1.bf16.msra.mxu0 %v445_v10 }
  0x42   : > { %393 = vmatprep.subr.msk.mxu0 %vm233_vm1, %v222_v11 }
  0x45   : > { %394 = vmatpush1.msk.msra.mxu0 %vm233_vm1, %v221_v12 }
  0x46   : > { %305 = vmatmul.mubr.f32.vlgmr.msra.gmra.mrb[0].mxu0 %v171_v13 }
  0x86   : > { %v227_v14 = vpop.permute.xlu0 %226 }
 0x119   : > { %v306_v15 = vpop.f32.mrb[0].mxu0 }
 0x11a   : > { %v307_v16 = vadd.f32 %v306_v15, %v227_v14  ;;  %v308_v17 = vpop.f32.mrb[1].mxu0 }
 0x11b   : > { %v309_v18 = vadd.f32 %v308_v17, %v227_v14 }
 0x11d   : > { %v311_v19 = vadd.f32 %v309_v18, %v307_v16 }
 0x11f   : > { %312 = vadd.xlane.f32.xlu0 %v311_v19 }
 0x1ac   : > { %v313_v20 = vpop.xlane.xlu0 %312 }
 0x1ad   : > { %v315_v21 = vmul.f32 0.00390625, %v313_v20 }
 0x1af   : > { %v316_v22 = vsub.f32 %v307_v16, %v315_v21  ;;  %v317_v23 = vsub.f32 %v309_v18, %v315_v21 }
 0x1b1   : > { %v318_v24 = vmul.f32 %v316_v22, %v316_v22  ;;  %v319_v25 = vmul.f32 %v317_v23, %v317_v23 }
 0x1b3   : > { %v320_v26 = vadd.f32 %v319_v25, %v318_v24 }
 0x1b5   : > { %321 = vadd.xlane.f32.xlu1 %v320_v26 }
 0x242   : > { %v322_v27 = vpop.xlane.xlu1 %321 }
 0x243   : > { %v323_v28 = vmul.f32 0.00390625, %v322_v27 }
 0x245   : > { %v324_v29 = vadd.f32 1e-05, %v323_v28 }
 0x247   : > { %458 = vrsqrt.f32 %v324_v29 }
 0x251   : > { %v459_v30 = vpop.eup %458 }
 0x252   : > { %v326_v31 = vmul.f32 %v459_v30, %v316_v22  ;;  %v327_v32 = vmul.f32 %v459_v30, %v317_v23 }
 0x254   : > { %328 = vst [vmem:[%s170_s27] sm:$0xff] %v326_v31  ;;  %329 = vst [vmem:[%s170_s27 + $0x8] sm:$0xff] %v327_v32 }
 0x255 PF: > { %s13_s12 = sadd.s32 1, %s466_s12  }
 0x256   : > { %p10_p4 = scmp.ge.s32.totalorder %s13_s12, 4  }
 0x258   :  { %12 = sbr.rel (!%p10_p4) target bundleno = 1 (0x1), region = 62 }

</bundles_post_ra>
